<compile_context>
chip_gen: v6e
topology: v6e:2x2x1
jax: 0.10.0
libtpu: 0.0.40
codegen_flags: <defaults>
</compile_context>

<pallas_src>
import functools

import jax
import jax.numpy as jnp
from jax import lax
from jax.experimental import pallas as pl
from jax.experimental.pallas import tpu as pltpu

LN_EPS = 1e-5


def _vmem_capacity_bytes():
    try:
        cap = int(pltpu.get_tpu_info().vmem_capacity_bytes)
        if cap > 0:
            return cap
    except Exception:
        pass
    # Conservative fallback (v7x-sized) if the query is unavailable.
    return 64 * 1024 * 1024


# ----------------------------------------------------------------------------
# Kernel 1: input LayerNorm + fused projections/gates, channel-major outputs
# ----------------------------------------------------------------------------
def proj_kernel(x_ref, m_ref, wall_ref, g1_ref, b1_ref,
                a_ref, b_ref, g_ref, *, C):
    x = x_ref[...].astype(jnp.float32)                        # [tm, C]
    mu = jnp.mean(x, axis=-1, keepdims=True)
    var = jnp.mean((x - mu) ** 2, axis=-1, keepdims=True)
    ln = (x - mu) * lax.rsqrt(var + LN_EPS)
    ln = ln * g1_ref[...] + b1_ref[...]                       # [tm, C] fp32
    ln16 = ln.astype(jnp.bfloat16)

    # One fused MXU matmul for all five projections:
    #   h[o, r] = sum_c W_all[c, o] * ln[r, c]   ->   [5C, tm]  (channel-major)
    # NOTE: contraction is on the lane dim of both operands; Mosaic feeds the
    # RHS transposed into the MXU without a standalone XLU transpose.
    h = lax.dot_general(wall_ref[...], ln16,
                        (((1,), (1,)), ((), ())),
                        preferred_element_type=jnp.float32)

    m = m_ref[...].astype(jnp.float32)                        # [1, tm]

    pa = h[0 * C:1 * C]                                       # left projection
    pb = h[1 * C:2 * C]                                       # right projection
    ga = h[2 * C:3 * C]                                       # left gate
    gb = h[3 * C:4 * C]                                       # right gate
    gl = h[4 * C:5 * C]                                       # output gate

    a_ref[...] = (pa * m * jax.nn.sigmoid(ga)).astype(a_ref.dtype)
    b_ref[...] = (pb * m * jax.nn.sigmoid(gb)).astype(b_ref.dtype)
    g_ref[...] = jax.nn.sigmoid(gl).astype(g_ref.dtype)


# ----------------------------------------------------------------------------
# Kernel 2: triangle einsum, TC channels (x one output-column tile) per step
#   outgoing : z[c,i,j] = sum_k a[c,k,j] * b[c,k,i]   (== b_c^T @ a_c)
#   incoming : z[c,i,j] = sum_k a[c,i,k] * b[c,j,k]   (== a_c @ b_c^T)
# z is accumulated in fp32 on the MXU and stored bf16 (HBM-traffic win).
# ----------------------------------------------------------------------------
def tri_kernel_out(a_ref, b_ref, o_ref, *, tc):
    # a block: [TC, Np(k), tj(j)]   b block: [TC, Np(k), Np(i)]
    def body(t, carry):
        a = a_ref[t]
        b = b_ref[t]
        out = lax.dot_general(b, a, (((0,), (0,)), ((), ())),
                              preferred_element_type=jnp.float32)   # [i, j]
        o_ref[t] = out.astype(o_ref.dtype)
        return carry
    lax.fori_loop(0, tc, body, None, unroll=True)


def tri_kernel_in(a_ref, b_ref, o_ref, *, tc):
    # a block: [TC, Np(i), Np(k)]   b block: [TC, tj(j), Np(k)]
    def body(t, carry):
        a = a_ref[t]
        b = b_ref[t]
        out = lax.dot_general(a, b, (((1,), (1,)), ((), ())),
                              preferred_element_type=jnp.float32)   # [i, j]
        o_ref[t] = out.astype(o_ref.dtype)
        return carry
    lax.fori_loop(0, tc, body, None, unroll=True)


# ----------------------------------------------------------------------------
# Kernel 3: center LayerNorm (over channels = sublanes) + output projection
#           + output gating.  Row-major store (bf16 transpose) for C >= 128,
#           lane-dense channel-major store for small C.
# ----------------------------------------------------------------------------
def out_kernel(z_ref, g_ref, wo_ref, g2_ref, b2_ref, y_ref, *, row_major):
    z = z_ref[...].astype(jnp.float32)                        # [C, tm]
    mu = jnp.mean(z, axis=0, keepdims=True)                   # [1, tm]
    var = jnp.mean((z - mu) ** 2, axis=0, keepdims=True)
    ln = (z - mu) * lax.rsqrt(var + LN_EPS)
    ln = ln * g2_ref[...] + b2_ref[...]                       # [C, tm]
    ln16 = ln.astype(jnp.bfloat16)

    # y_t[o, r] = sum_c wo[o, c] * ln[c, r]   (torch: x @ wo.T, channel-major)
    y = jnp.dot(wo_ref[...], ln16, preferred_element_type=jnp.float32)  # [C, tm]
    y = (y * g_ref[...].astype(jnp.float32)).astype(y_ref.dtype)        # gate + bf16

    if row_major:
        y_ref[...] = jnp.transpose(y)                         # bf16 transpose (XLU)
    else:
        y_ref[...] = y                                        # lane-dense [C, tm]


# ----------------------------------------------------------------------------
# Wrapper (reshapes / weight re-layout only)
# ----------------------------------------------------------------------------
def triangle_multiplication_pallas(act, mask, params, *, outgoing=True):
    N1, N2, C = act.shape
    assert N1 == N2, "triangle multiplication requires a square pair representation"
    N = N1

    # Pad N so NN is (8,128)-friendly.  For very large N pad straight to a
    # multiple of 128 so the K2 output-column tiling has a legal lane tile.
    pad_to = 128 if N > 1024 else 16
    Np = -(-N // pad_to) * pad_to
    if Np != N:
        act = jnp.pad(act, ((0, Np - N), (0, Np - N), (0, 0)))
        mask = jnp.pad(mask, ((0, Np - N), (0, Np - N)))
    NN = Np * Np

    # ---- generation-aware VMEM budgets ------------------------------------
    vmem_cap = _vmem_capacity_bytes()                  # 128 MiB v5e/v6e, 64 MiB v7x
    vmem_limit = int(min(vmem_cap * 3 // 4, 96 * 1024 * 1024))
    k2_budget = int(min(vmem_cap * 45 // 100, 48 * 1024 * 1024))
    tm_budget = int(min(vmem_cap // 3, 24 * 1024 * 1024))

    # ---- row tile for K1/K3 (largest multiple of 128 <= 2048 dividing NN,
    #      fitting the budget, keeping >= 2 grid steps for v7x megacore) -----
    x_bytes = jnp.dtype(act.dtype).itemsize
    per_row = 2 * C * x_bytes + 44 * C + 64            # blocks + fp32 temporaries (est.)
    tm_cap_rows = max(128, tm_budget // per_row)
    tm = 128
    t = 128
    while t <= min(NN // 2, 2048):
        if NN % t == 0 and t <= tm_cap_rows:
            tm = t
        t += 128

    # ---- K2 channel-group / column-tile selection --------------------------
    TC = 1
    for tcand in (8, 4, 2, 1):
        if C % tcand == 0 and (C // tcand) >= 2 and 12 * tcand * Np * Np <= k2_budget:
            TC = tcand
            break
    if 12 * TC * Np * Np <= k2_budget:
        tj = Np                                         # full per-channel residency
    else:
        # Np is a multiple of 128 here (pad_to == 128 for large N).
        tj = 128
        tt = 128
        while tt <= Np:
            if Np % tt == 0 and (8 * TC * Np * tt + 4 * TC * Np * Np) <= k2_budget:
                tj = tt
            tt += 128
        # TODO(synk): add k-tiling of the contraction (pl.when-guarded fp32
        # accumulator) for Np beyond ~2900 where the full-k operand itself no
        # longer fits v7x VMEM.

    wp, wg, wo, wgl = params["wp"], params["wg"], params["wo"], params["wgl"]
    g1, b1 = params["g1"], params["b1"]
    g2, b2 = params["g2"], params["b2"]

    # torch Linear: y = x @ W^T ; a = interleaved even channels, b = odd channels.
    wp_t, wg_t = wp.T, wg.T                                   # [C, 2C]
    wa, wb = wp_t[:, 0::2], wp_t[:, 1::2]                     # [C, C] each
    wga, wgb = wg_t[:, 0::2], wg_t[:, 1::2]
    wgl_t = wgl.T                                             # [C, C]

    # Fused projection weight: [5C, C] bf16 (one MXU matmul in kernel 1).
    w_all_t = jnp.concatenate([wa, wb, wga, wgb, wgl_t], axis=1).T.astype(jnp.bfloat16)
    wo_k = wo.astype(jnp.bfloat16)                            # used as wo @ ln
    # TODO(synk): optional fp8 (e4m3) a/b storage on v7x for a further HBM
    # traffic cut (needs accuracy re-validation at realistic sizes).

    x2 = act.reshape(NN, C)
    m_row = mask.reshape(1, NN).astype(jnp.float32)
    g1_2d, b1_2d = g1.reshape(1, C).astype(jnp.float32), b1.reshape(1, C).astype(jnp.float32)
    g2_col, b2_col = g2.reshape(C, 1).astype(jnp.float32), b2.reshape(C, 1).astype(jnp.float32)

    grid_rows = (NN // tm,)
    row_spec = pl.BlockSpec((tm, C), lambda i: (i, 0))        # row-major tiles
    cm_spec = pl.BlockSpec((C, tm), lambda i: (0, i))         # channel-major tiles

    # --- Kernel 1: LN + fused projection / gates -> channel-major a, b, gate --
    a_t, b_t, g_t = pl.pallas_call(
        functools.partial(proj_kernel, C=C),
        out_shape=(jax.ShapeDtypeStruct((C, NN), jnp.bfloat16),
                   jax.ShapeDtypeStruct((C, NN), jnp.bfloat16),
                   jax.ShapeDtypeStruct((C, NN), jnp.bfloat16)),
        grid_spec=pltpu.PrefetchScalarGridSpec(
            num_scalar_prefetch=0,
            grid=grid_rows,
            in_specs=[row_spec,                                   # x
                      pl.BlockSpec((1, tm), lambda i: (0, i)),    # mask (row vec)
                      pl.BlockSpec((5 * C, C), lambda i: (0, 0)), # fused weights
                      pl.BlockSpec((1, C), lambda i: (0, 0)),     # g1
                      pl.BlockSpec((1, C), lambda i: (0, 0))],    # b1
            out_specs=[cm_spec, cm_spec, cm_spec]),
        compiler_params=pltpu.CompilerParams(
            dimension_semantics=("parallel",), vmem_limit_bytes=vmem_limit),
    )(x2, m_row, w_all_t, g1_2d, b1_2d)

    # --- Kernel 2: per-channel triangle matmul (bf16 z store) -----------------
    a_3d = a_t.reshape(C, Np, Np)                             # free reshape
    b_3d = b_t.reshape(C, Np, Np)
    z_spec = pl.BlockSpec((TC, Np, tj), lambda c, r: (c, 0, r))
    if outgoing:
        k2_in_specs = [pl.BlockSpec((TC, Np, tj), lambda c, r: (c, 0, r)),  # a (k, j-tile)
                       pl.BlockSpec((TC, Np, Np), lambda c, r: (c, 0, 0))]  # b full (k, i)
        k2_kernel = functools.partial(tri_kernel_out, tc=TC)
    else:
        k2_in_specs = [pl.BlockSpec((TC, Np, Np), lambda c, r: (c, 0, 0)),  # a full (i, k)
                       pl.BlockSpec((TC, tj, Np), lambda c, r: (c, r, 0))]  # b (j-tile, k)
        k2_kernel = functools.partial(tri_kernel_in, tc=TC)

    z_t = pl.pallas_call(
        k2_kernel,
        out_shape=jax.ShapeDtypeStruct((C, Np, Np), jnp.bfloat16),
        grid_spec=pltpu.PrefetchScalarGridSpec(
            num_scalar_prefetch=0,
            grid=(C // TC, Np // tj),
            in_specs=k2_in_specs,
            out_specs=z_spec),
        compiler_params=pltpu.CompilerParams(
            dimension_semantics=("parallel", "parallel"),
            vmem_limit_bytes=vmem_limit),
    )(a_3d, b_3d)
    z2 = z_t.reshape(C, NN)                                   # free reshape

    # --- Kernel 3: center LN + output projection + gating ---------------------
    row_major_out = C >= 128       # small C: keep lane-dense channel-major output
    if row_major_out:
        out_shape = jax.ShapeDtypeStruct((NN, C), jnp.bfloat16)
        out_spec = row_spec
    else:
        out_shape = jax.ShapeDtypeStruct((C, NN), jnp.bfloat16)
        out_spec = cm_spec

    y = pl.pallas_call(
        functools.partial(out_kernel, row_major=row_major_out),
        out_shape=out_shape,
        grid_spec=pltpu.PrefetchScalarGridSpec(
            num_scalar_prefetch=0,
            grid=grid_rows,
            in_specs=[cm_spec,                                    # z  (channel-major, bf16)
                      cm_spec,                                    # output gate
                      pl.BlockSpec((C, C), lambda i: (0, 0)),     # wo
                      pl.BlockSpec((C, 1), lambda i: (0, 0)),     # g2
                      pl.BlockSpec((C, 1), lambda i: (0, 0))],    # b2
            out_specs=out_spec),
        compiler_params=pltpu.CompilerParams(
            dimension_semantics=("parallel",), vmem_limit_bytes=vmem_limit),
    )(z2, g_t, wo_k, g2_col, b2_col)

    if row_major_out:
        y = y.reshape(Np, Np, C)
    else:
        # Final relayout for small C done outside the kernel (cheap vs masked
        # quarter-lane stores inside it).
        y = jnp.transpose(y.reshape(C, Np, Np), (1, 2, 0))
    if Np != N:
        y = y[:N, :N, :]
    return y
    # TODO(synk): fully-fused single-pallas_call path for tiny N*N*C that fit
    # entirely in VMEM (removes the a/b/g/z HBM round trips + launch overhead).


# ----------------------------------------------------------------------------
# Pure-JAX reference (fp32) mirroring the torch module semantics
# ----------------------------------------------------------------------------
def _layer_norm(x, g, b):
    mu = jnp.mean(x, axis=-1, keepdims=True)
    var = jnp.mean((x - mu) ** 2, axis=-1, keepdims=True)
    return (x - mu) * lax.rsqrt(var + LN_EPS) * g + b


def triangle_multiplication_ref(act, mask, params, *, outgoing=True):
    x = act.astype(jnp.float32)
    ln = _layer_norm(x, params["g1"], params["b1"])
    proj = ln @ params["wp"].T                       # [N, N, 2C]
    proj = proj * mask.astype(jnp.float32)[:, :, None]
    proj = proj * jax.nn.sigmoid(ln @ params["wg"].T)
    a = proj[..., 0::2]                              # interleaved split (chunk 0)
    b = proj[..., 1::2]                              # interleaved split (chunk 1)
    if outgoing:
        z = jnp.einsum("kjc,kic->ijc", a, b)
    else:
        z = jnp.einsum("ikc,jkc->ijc", a, b)
    zl = _layer_norm(z, params["g2"], params["b2"])
    out = zl @ params["wo"].T
    gate_out = jax.nn.sigmoid(ln @ params["wgl"].T)
    return out * gate_out


# ----------------------------------------------------------------------------
def init_params(key, C):
    ks = jax.random.split(key, 4)
    return {
        "wp": (jax.random.normal(ks[0], (2 * C, C), jnp.float32) * 0.1),
        "wg": (jax.random.normal(ks[1], (2 * C, C), jnp.float32) * 0.1),
        "wo": (jax.random.normal(ks[2], (C, C), jnp.float32) * 0.1),
        "wgl": (jax.random.normal(ks[3], (C, C), jnp.float32) * 0.1),
        "g1": jnp.ones((C,), jnp.float32), "b1": jnp.zeros((C,), jnp.float32),
        "g2": jnp.ones((C,), jnp.float32), "b2": jnp.zeros((C,), jnp.float32),
    }


if __name__ == "__main__":
    # act = torch.randn(B, S, HS), mask = torch.rand(B, S)  with B == S (pair rep)
    B = S = 16
    HS = 32
    equation = "kjc,kic->ijc"            # -> 'ckj,cki->cij'  (outgoing variant)
    outgoing = equation == "kjc,kic->ijc"

    key = jax.random.PRNGKey(0)
    k_act, k_mask, k_par = jax.random.split(key, 3)
    act = jax.random.normal(k_act, (B, S, HS), jnp.float32).astype(jnp.bfloat16)
    mask = jax.random.uniform(k_mask, (B, S), jnp.float32)
    params = init_params(k_par, HS)

    y = triangle_multiplication_pallas(act, mask, params, outgoing=outgoing)
    y = jax.block_until_ready(y)
    assert y.shape == (B, S, HS) and y.dtype == jnp.bfloat16

    y_ref = triangle_multiplication_ref(act, mask, params, outgoing=outgoing)
    err = float(jnp.max(jnp.abs(y.astype(jnp.float32) - y_ref)))
    assert err < 0.1, f"max abs error too large: {err}"

    print("KERNEL_OK")
</pallas_src>

<mosaic_0001>
module attributes {stable_mosaic.version = 11 : i64} {
  func.func @proj_kernel(%arg0: i32, %arg1: memref<128x32xbf16, #tpu.memory_space<vmem>>, %arg2: memref<1x128xf32, #tpu.memory_space<vmem>>, %arg3: memref<160x32xbf16, #tpu.memory_space<vmem>>, %arg4: memref<1x32xf32, #tpu.memory_space<vmem>>, %arg5: memref<1x32xf32, #tpu.memory_space<vmem>>, %arg6: memref<32x128xbf16, #tpu.memory_space<vmem>>, %arg7: memref<32x128xbf16, #tpu.memory_space<vmem>>, %arg8: memref<32x128xbf16, #tpu.memory_space<vmem>>) attributes {dimension_semantics = [#tpu.dimension_semantics<parallel>], iteration_bounds = array<i64: 2>, scalar_prefetch = 0 : i64, scratch_operands = 0 : i64, tpu.core_type = #tpu.core_type<tc>, window_params = [{transform_indices = @transform_0, window_bounds = array<i64: 128, 32>}, {transform_indices = @transform_1, window_bounds = array<i64: 1, 128>}, {pipeline_mode = #tpu.pipeline_mode<synchronous>, transform_indices = @transform_2, window_bounds = array<i64: 160, 32>}, {pipeline_mode = #tpu.pipeline_mode<synchronous>, transform_indices = @transform_3, window_bounds = array<i64: 1, 32>}, {pipeline_mode = #tpu.pipeline_mode<synchronous>, transform_indices = @transform_4, window_bounds = array<i64: 1, 32>}, {transform_indices = @transform_5, window_bounds = array<i64: 32, 128>}, {transform_indices = @transform_6, window_bounds = array<i64: 32, 128>}, {transform_indices = @transform_7, window_bounds = array<i64: 32, 128>}]} {
    %c0 = arith.constant 0 : index
    %c0_0 = arith.constant 0 : index
    %0 = vector.load %arg1[%c0, %c0_0] : memref<128x32xbf16, #tpu.memory_space<vmem>>, vector<128x32xbf16>
    %1 = arith.extf %0 : vector<128x32xbf16> to vector<128x32xf32>
    %cst = arith.constant dense<0.000000e+00> : vector<128xf32>
    %2 = vector.multi_reduction <add>, %1, %cst [1] : vector<128x32xf32> to vector<128xf32>
    %3 = vector.shape_cast %2 : vector<128xf32> to vector<128x1xf32>
    %cst_1 = arith.constant 3.200000e+01 : f32
    %4 = vector.broadcast %cst_1 : f32 to vector<128x1xf32>
    %5 = arith.divf %3, %4 : vector<128x1xf32>
    %6 = vector.broadcast %5 : vector<128x1xf32> to vector<128x32xf32>
    %7 = arith.subf %1, %6 : vector<128x32xf32>
    %8 = arith.mulf %7, %7 : vector<128x32xf32>
    %cst_2 = arith.constant dense<0.000000e+00> : vector<128xf32>
    %9 = vector.multi_reduction <add>, %8, %cst_2 [1] : vector<128x32xf32> to vector<128xf32>
    %10 = vector.shape_cast %9 : vector<128xf32> to vector<128x1xf32>
    %cst_3 = arith.constant 3.200000e+01 : f32
    %11 = vector.broadcast %cst_3 : f32 to vector<128x1xf32>
    %12 = arith.divf %10, %11 : vector<128x1xf32>
    %13 = vector.broadcast %5 : vector<128x1xf32> to vector<128x32xf32>
    %14 = arith.subf %1, %13 : vector<128x32xf32>
    %cst_4 = arith.constant 9.99999974E-6 : f32
    %15 = vector.broadcast %cst_4 : f32 to vector<128x1xf32>
    %16 = arith.addf %12, %15 : vector<128x1xf32>
    %17 = math.rsqrt %16 : vector<128x1xf32>
    %18 = vector.broadcast %17 : vector<128x1xf32> to vector<128x32xf32>
    %19 = arith.mulf %14, %18 : vector<128x32xf32>
    %c0_5 = arith.constant 0 : index
    %c0_6 = arith.constant 0 : index
    %20 = vector.load %arg4[%c0_5, %c0_6] : memref<1x32xf32, #tpu.memory_space<vmem>>, vector<1x32xf32>
    %21 = vector.broadcast %20 : vector<1x32xf32> to vector<128x32xf32>
    %22 = arith.mulf %19, %21 : vector<128x32xf32>
    %c0_7 = arith.constant 0 : index
    %c0_8 = arith.constant 0 : index
    %23 = vector.load %arg5[%c0_7, %c0_8] : memref<1x32xf32, #tpu.memory_space<vmem>>, vector<1x32xf32>
    %24 = vector.broadcast %23 : vector<1x32xf32> to vector<128x32xf32>
    %25 = arith.addf %22, %24 : vector<128x32xf32>
    %26 = arith.truncf %25 : vector<128x32xf32> to vector<128x32xbf16>
    %c0_9 = arith.constant 0 : index
    %c0_10 = arith.constant 0 : index
    %27 = vector.load %arg3[%c0_9, %c0_10] : memref<160x32xbf16, #tpu.memory_space<vmem>>, vector<160x32xbf16>
    %cst_11 = arith.constant dense<0.000000e+00> : vector<160x128xf32>
    %28 = tpu.matmul %27, %26, %cst_11 {dimension_numbers = #tpu.dot_dimension_numbers<[1], [1], [0], [0], [0, 0, 1, 0], [], []>} : vector<160x32xbf16>, vector<128x32xbf16>, vector<160x128xf32> -> vector<160x128xf32>
    %c0_12 = arith.constant 0 : index
    %c0_13 = arith.constant 0 : index
    %29 = vector.load %arg2[%c0_12, %c0_13] : memref<1x128xf32, #tpu.memory_space<vmem>>, vector<1x128xf32>
    %30 = vector.extract_strided_slice %28 {offsets = [0, 0], sizes = [32, 128], strides = [1, 1]} : vector<160x128xf32> to vector<32x128xf32>
    %31 = vector.extract_strided_slice %28 {offsets = [32, 0], sizes = [32, 128], strides = [1, 1]} : vector<160x128xf32> to vector<32x128xf32>
    %32 = vector.extract_strided_slice %28 {offsets = [64, 0], sizes = [32, 128], strides = [1, 1]} : vector<160x128xf32> to vector<32x128xf32>
    %33 = vector.extract_strided_slice %28 {offsets = [96, 0], sizes = [32, 128], strides = [1, 1]} : vector<160x128xf32> to vector<32x128xf32>
    %34 = vector.extract_strided_slice %28 {offsets = [128, 0], sizes = [32, 128], strides = [1, 1]} : vector<160x128xf32> to vector<32x128xf32>
    %35 = vector.broadcast %29 : vector<1x128xf32> to vector<32x128xf32>
    %36 = arith.mulf %30, %35 : vector<32x128xf32>
    %37 = arith.negf %32 : vector<32x128xf32>
    %38 = math.exp %37 : vector<32x128xf32>
    %cst_14 = arith.constant 1.000000e+00 : f32
    %39 = vector.broadcast %cst_14 : f32 to vector<32x128xf32>
    %40 = arith.addf %39, %38 : vector<32x128xf32>
    %41 = arith.divf %39, %40 : vector<32x128xf32>
    %42 = arith.mulf %36, %41 : vector<32x128xf32>
    %43 = arith.truncf %42 : vector<32x128xf32> to vector<32x128xbf16>
    %c0_15 = arith.constant 0 : index
    %c0_16 = arith.constant 0 : index
    %44 = vector.load %arg6[%c0_15, %c0_16] : memref<32x128xbf16, #tpu.memory_space<vmem>>, vector<32x128xbf16>
    tpu.vector_store %arg6[%c0_15, %c0_16], %43 {strides = array<i32>} : memref<32x128xbf16, #tpu.memory_space<vmem>>, vector<32x128xbf16>,
    %45 = vector.broadcast %29 : vector<1x128xf32> to vector<32x128xf32>
    %46 = arith.mulf %31, %45 : vector<32x128xf32>
    %47 = arith.negf %33 : vector<32x128xf32>
    %48 = math.exp %47 : vector<32x128xf32>
    %cst_17 = arith.constant 1.000000e+00 : f32
    %49 = vector.broadcast %cst_17 : f32 to vector<32x128xf32>
    %50 = arith.addf %49, %48 : vector<32x128xf32>
    %51 = arith.divf %49, %50 : vector<32x128xf32>
    %52 = arith.mulf %46, %51 : vector<32x128xf32>
    %53 = arith.truncf %52 : vector<32x128xf32> to vector<32x128xbf16>
    %c0_18 = arith.constant 0 : index
    %c0_19 = arith.constant 0 : index
    %54 = vector.load %arg7[%c0_18, %c0_19] : memref<32x128xbf16, #tpu.memory_space<vmem>>, vector<32x128xbf16>
    tpu.vector_store %arg7[%c0_18, %c0_19], %53 {strides = array<i32>} : memref<32x128xbf16, #tpu.memory_space<vmem>>, vector<32x128xbf16>,
    %55 = arith.negf %34 : vector<32x128xf32>
    %56 = math.exp %55 : vector<32x128xf32>
    %cst_20 = arith.constant 1.000000e+00 : f32
    %57 = vector.broadcast %cst_20 : f32 to vector<32x128xf32>
    %58 = arith.addf %57, %56 : vector<32x128xf32>
    %59 = arith.divf %57, %58 : vector<32x128xf32>
    %60 = arith.truncf %59 : vector<32x128xf32> to vector<32x128xbf16>
    %c0_21 = arith.constant 0 : index
    %c0_22 = arith.constant 0 : index
    %61 = vector.load %arg8[%c0_21, %c0_22] : memref<32x128xbf16, #tpu.memory_space<vmem>>, vector<32x128xbf16>
    tpu.vector_store %arg8[%c0_21, %c0_22], %60 {strides = array<i32>} : memref<32x128xbf16, #tpu.memory_space<vmem>>, vector<32x128xbf16>,
    return
  }
  func.func @transform_0(%arg0: i32) -> (i32, i32) {
    %c0_i32 = arith.constant 0 : i32
    %c0_i32_0 = arith.constant 0 : i32
    return %arg0, %c0_i32 : i32, i32
  }
  func.func @transform_1(%arg0: i32) -> (i32, i32) {
    %c0_i32 = arith.constant 0 : i32
    %c0_i32_0 = arith.constant 0 : i32
    return %c0_i32, %arg0 : i32, i32
  }
  func.func @transform_2(%arg0: i32) -> (i32, i32) {
    %c0_i32 = arith.constant 0 : i32
    %c0_i32_0 = arith.constant 0 : i32
    %c0_i32_1 = arith.constant 0 : i32
    return %c0_i32, %c0_i32_0 : i32, i32
  }
  func.func @transform_3(%arg0: i32) -> (i32, i32) {
    %c0_i32 = arith.constant 0 : i32
    %c0_i32_0 = arith.constant 0 : i32
    %c0_i32_1 = arith.constant 0 : i32
    return %c0_i32, %c0_i32_0 : i32, i32
  }
  func.func @transform_4(%arg0: i32) -> (i32, i32) {
    %c0_i32 = arith.constant 0 : i32
    %c0_i32_0 = arith.constant 0 : i32
    %c0_i32_1 = arith.constant 0 : i32
    return %c0_i32, %c0_i32_0 : i32, i32
  }
  func.func @transform_5(%arg0: i32) -> (i32, i32) {
    %c0_i32 = arith.constant 0 : i32
    %c0_i32_0 = arith.constant 0 : i32
    return %c0_i32, %arg0 : i32, i32
  }
  func.func @transform_6(%arg0: i32) -> (i32, i32) {
    %c0_i32 = arith.constant 0 : i32
    %c0_i32_0 = arith.constant 0 : i32
    return %c0_i32, %arg0 : i32, i32
  }
  func.func @transform_7(%arg0: i32) -> (i32, i32) {
    %c0_i32 = arith.constant 0 : i32
    %c0_i32_0 = arith.constant 0 : i32
    return %c0_i32, %arg0 : i32, i32
  }
}

</mosaic_0001>

<bundles_post_ra>
// kernel: tpu_custom_call.1
= control target key start
LH: loop header
LB: loop body
LE: loop exit
PB: predicated region body
PF: predicated region fallthrough
CT: control target
= control target key end

     0   :  { %13 = vsyncpa [#allocation3], 0  ;;  %s2268_s0 = inlined_call_operand.vmem [shape: bf16[256,32], index: 0, kind: input, shape index: {}]   ;;  %s2269_s1 = inlined_call_operand.vmem [shape: f32[1,256], index: 1, kind: input, shape index: {}]   ;;  %s2270_s2 = inlined_call_operand.vmem [shape: bf16[160,32], index: 2, kind: input, shape index: {}]   ;;  %s2271_s3 = inlined_call_operand.vmem [shape: f32[1,32], index: 3, kind: input, shape index: {}]   ;;  %s2272_s4 = inlined_call_operand.vmem [shape: f32[1,32], index: 4, kind: input, shape index: {}]   ;;  %s2273_s5 = inlined_call_operand.hbm [shape: bf16[32,256], index: 5, kind: output, shape index: {0}]   ;;  %s2274_s6 = inlined_call_operand.hbm [shape: bf16[32,256], index: 6, kind: output, shape index: {1}]   ;;  %s2275_s7 = inlined_call_operand.hbm [shape: bf16[32,256], index: 7, kind: output, shape index: {2}]  }
   0x1   :  { %15 = vsyncpa [#allocation3 + $0x1], 0 }
   0x2   :  { %16 = vsyncpa [#allocation5], 0 }
   0x3   :  { %18 = vsyncpa [#allocation5 + $0x1], 0  ;;  %s1725_s24 = smov 0   ;;  %s1727_s25 = smov 0  }
   0x4   :  { %s1729_s26 = smov 0   ;;  %s1731_s27 = smov 0  }
   0x5 LB: > { %s1746_s28 = sadd.s32 4294967295, %s1677_s27   ;;  %s2276_s29 = sadd.s32 4294967294, %s1677_s27   ;;  %s1677_s27 = sphi %s1731_s27, %s2292_s27   ;;  %s1673_s26 = sphi %s1729_s26, %s2291_s26   ;;  %s1669_s25 = sphi %s1727_s25, %s2290_s25   ;;  %s1665_s24 = sphi %s1725_s24, %s2289_s24  }
   0x6   : > { %s1750_s30 = sadd.s32 1, %s1677_s27   ;;  %s146_s8 = sadd.s32 1, %s1673_s26 }
   0x7   : > { %s143_s9 = ssub.s32 %s1677_s27, %s1750_s30  ;;  %p156_p0 = scmp.ne.s32.totalorder %s1673_s26, %s1669_s25 }
   0x8   : > { %p144_p1 = scmp.eq.s32.totalorder %s143_s9, 0  ;;  %p157_p2 = scmp.eq.s32.totalorder %s1746_s28, 1 }
   0x9   : > { %p162_p3 = scmp.ne.s32.totalorder %s1669_s25, %s1665_s24  ;;  %p163_p4 = scmp.eq.s32.totalorder %s2276_s29, 1 }
   0xa   : > { %s1763_s10 = scalar_select %p144_p1, %s1673_s26, %s146_s8  }
   0xb   : > { %p1765_p5 = por %p157_p2, %p156_p0  ;;  %p1769_p6 = por %p163_p4, %p162_p3 }
   0xc   : > { %p1188_p7 = scmp.ge.s32.totalorder %s1677_s27, 1  ;;  %p257_p8 = scmp.lt.s32.totalorder %s1677_s27, 3 }
   0xe   : > { %p258_p9 = pnand %p1188_p7, %p257_p8 }
   0xf   : > { %s1192_s13 = sshll.u32 (!%p258_p9), %s1746_s28, 4  ;;  %p308_p11 = scmp.lt.s32.totalorder (!%p258_p9), %s1746_s28, 1 }
  0x10   : > { %261 = sbr.rel (%p258_p9) target bundleno = 703 (0x2bf), region = 40  ;;  %p303_p10 = scmp.lt.s32.totalorder (!%p258_p9), %s1192_s13, 31 }
  0x11   : > { %s1005_s8 = sand.u32 (!%p258_p9), 1, %s1746_s28   ;;  %s2131_s9 = sshll.u32 (!%p258_p9), %s1746_s28, 6 }
  0x12   : > { %s2145_s18 = scalar_lea.sflag (!%p258_p9), [#allocation5], %s1005_s8 }
  0x15   : > { %s2294_s13 = smov (!%p303_p10, %s1192_s13), 31  ;;  %vm344_vm0 = vcmask 261120  }
  0x16   : > { %s1193_s14 = sshll.u32 %s2294_s13, 2 }
  0x17   : > { %s1779_s17 = scalar_lea.vmem %s2268_s0, %s1193_s14 }
  0x18   : > { %v1782_v0 = vld [vmem:[%s1779_s17 + $0x38] sm:$0xff]   ;;  %v1785_v1 = vld [vmem:[%s1779_s17 + $0x30] sm:$0xff]   ;;  %v1792_v6 = vld [vmem:[%s1779_s17 + $0x28] sm:$0xff]   ;;  %s309_s16 = scalar_select %p308_p11, %s1746_s28, 1 }
  0x19   : > { %v1291_v2 = vunpack.c.l.bf16 %v1782_v0  ;;  %v1292_v3 = vunpack.c.h.bf16 %v1782_v0  ;;  %v1287_v4 = vunpack.c.l.bf16 %v1785_v1  ;;  %v1288_v5 = vunpack.c.h.bf16 %v1785_v1  ;;  %v1805_v13 = vld [vmem:[%s1779_s17 + $0x20] sm:$0xff]   ;;  %v1816_v18 = vld [vmem:[%s1779_s17 + $0x18] sm:$0xff]   ;;  %v1827_v23 = vld [vmem:[%s1779_s17 + $0x10] sm:$0xff]   ;;  %s2139_s28 = scalar_lea.hbm %s2274_s6, %s2131_s9 }
  0x1a   : > { %v1283_v11 = vunpack.c.l.bf16 %v1792_v6  ;;  %v1284_v12 = vunpack.c.h.bf16 %v1792_v6  ;;  %v1279_v16 = vunpack.c.l.bf16 %v1805_v13  ;;  %v1280_v17 = vunpack.c.h.bf16 %v1805_v13  ;;  %v1838_v28 = vld [vmem:[%s1779_s17 + $0x8] sm:$0xff]   ;;  %v1849_v33 = vld [vmem:[%s1779_s17] sm:$0xff]   ;;  %s2277_s17 = sand.u32 1, %s1669_s25   ;;  %s310_s20 = scalar_lea.vmem %s2269_s1, %s309_s16 }
  0x1b   : > { %v387_v7 = vsel %vm344_vm0, %v1291_v2, 0.0  ;;  %v381_v8 = vsel %vm344_vm0, %v1287_v4, 0.0  ;;  %v390_v9 = vsel %vm344_vm0, %v1292_v3, 0.0  ;;  %v384_v10 = vsel %vm344_vm0, %v1288_v5, 0.0  ;;  %s2117_s21 = sshll.u32 %s2277_s17, 4 }
  0x1c   : > { %388 = vadd.xlane.f32.xlu0 %v387_v7  ;;  %382 = vadd.xlane.f32.xlu1 %v381_v8  ;;  %v375_v14 = vsel %vm344_vm0, %v1283_v11, 0.0  ;;  %v378_v15 = vsel %vm344_vm0, %v1284_v12, 0.0  ;;  %v369_v19 = vsel %vm344_vm0, %v1279_v16, 0.0  ;;  %v372_v20 = vsel %vm344_vm0, %v1280_v17, 0.0  ;;  %s294_s22 = scalar_lea.vmem [#allocation4], %s2117_s21  ;;  %s2142_s15 = scalar_lea.vmem [#allocation6], %s2117_s21 }
  0x1d   : > { %v1275_v21 = vunpack.c.l.bf16 %v1816_v18  ;;  %v1276_v22 = vunpack.c.h.bf16 %v1816_v18  ;;  %v1271_v26 = vunpack.c.l.bf16 %v1827_v23  ;;  %v1272_v27 = vunpack.c.h.bf16 %v1827_v23  ;;  %s1038_s23 = sshll.u32 %s294_s22, 4  ;;  %s2133_s23 = int_to_ptr.vmem [resolvable:$true] %s1038_s23 }
  0x1e   : > { %v1267_v31 = vunpack.c.l.bf16 %v1838_v28  ;;  %v1268_v32 = vunpack.c.h.bf16 %v1838_v28  ;;  %v1263_v36 = vunpack.c.l.bf16 %v1849_v33  ;;  %v1264_v37 = vunpack.c.h.bf16 %v1849_v33  ;;  %s1561_s19 = scalar_lea.vmem %s2133_s23, 256 }
  0x1f   : > { %v363_v24 = vsel %vm344_vm0, %v1275_v21, 0.0  ;;  %v366_v25 = vsel %vm344_vm0, %v1276_v22, 0.0  ;;  %v357_v29 = vsel %vm344_vm0, %v1271_v26, 0.0  ;;  %v360_v30 = vsel %vm344_vm0, %v1272_v27, 0.0  ;;  %p1562_p12 = scmp.ne.s32.totalorder %s2133_s23, %s1561_s19 }
  0x20   : > { %391 = vadd.xlane.f32.xlu0 %v390_v9  ;;  %385 = vadd.xlane.f32.xlu1 %v384_v10  ;;  %v351_v34 = vsel %vm344_vm0, %v1267_v31, 0.0  ;;  %v354_v35 = vsel %vm344_vm0, %v1268_v32, 0.0  ;;  %v345_v38 = vsel %vm344_vm0, %v1263_v36, 0.0  ;;  %v348_v39 = vsel %vm344_vm0, %v1264_v37, 0.0 }
  0x21   : > { %p1563_p13 = pnand %p1562_p12, %p1765_p5 }
  0x23   : > { %p1564_p0 = pneg %p1563_p13 }
  0x24   : > { %376 = vadd.xlane.f32.xlu0 %v375_v14  ;;  %379 = vadd.xlane.f32.xlu1 %v378_v15 }
  0x28   : > { %370 = vadd.xlane.f32.xlu0 %v369_v19  ;;  %373 = vadd.xlane.f32.xlu1 %v372_v20 }
  0x2c   : > { %364 = vadd.xlane.f32.xlu0 %v363_v24  ;;  %367 = vadd.xlane.f32.xlu1 %v366_v25 }
  0x30   : > { %358 = vadd.xlane.f32.xlu0 %v357_v29  ;;  %361 = vadd.xlane.f32.xlu1 %v360_v30 }
  0x34   : > { %352 = vadd.xlane.f32.xlu0 %v351_v34  ;;  %355 = vadd.xlane.f32.xlu1 %v354_v35 }
  0x38   : > { %346 = vadd.xlane.f32.xlu0 %v345_v38  ;;  %349 = vadd.xlane.f32.xlu1 %v348_v39 }
  0xa5   : > { %v389_v40 = vpop.xlane.xlu0 %388  ;;  %v383_v41 = vpop.xlane.xlu1 %382 }
  0xa6   : > { %v408_v42 = vmul.f32 0.03125, %v389_v40  ;;  %v406_v43 = vmul.f32 0.03125, %v383_v41 }
  0xa8   : > { %v1865_v44 = vsub.f32 %v1291_v2, %v408_v42  ;;  %v1867_v45 = vsub.f32 %v1287_v4, %v406_v43 }
  0xa9   : > { %v392_v46 = vpop.xlane.xlu0 %391  ;;  %v386_v47 = vpop.xlane.xlu1 %385 }
  0xaa   : > { %v409_v48 = vmul.f32 0.03125, %v392_v46  ;;  %v407_v49 = vmul.f32 0.03125, %v386_v47  ;;  %v440_v50 = vmul.f32 %v1865_v44, %v1865_v44  ;;  %v438_v51 = vmul.f32 %v1867_v45, %v1867_v45 }
  0xac   : > { %v1875_v52 = vsub.f32 %v1292_v3, %v409_v48  ;;  %v1879_v53 = vsub.f32 %v1288_v5, %v407_v49  ;;  %v484_v54 = vsel %vm344_vm0, %v440_v50, 0.0  ;;  %v478_v57 = vsel %vm344_vm0, %v438_v51, 0.0 }
  0xad   : > { %v377_v55 = vpop.xlane.xlu0 %376  ;;  %485 = vadd.xlane.f32.xlu0 %v484_v54  ;;  %v380_v56 = vpop.xlane.xlu1 %379 }
  0xae   : > { %v404_v58 = vmul.f32 0.03125, %v377_v55  ;;  %v405_v59 = vmul.f32 0.03125, %v380_v56  ;;  %v441_v60 = vmul.f32 %v1875_v52, %v1875_v52  ;;  %v439_v61 = vmul.f32 %v1879_v53, %v1879_v53 }
  0xb0   : > { %v1889_v62 = vsub.f32 %v1283_v11, %v404_v58  ;;  %v1893_v63 = vsub.f32 %v1284_v12, %v405_v59  ;;  %v487_v0 = vsel %vm344_vm0, %v441_v60, 0.0  ;;  %v481_v3 = vsel %vm344_vm0, %v439_v61, 0.0 }
  0xb1   : > { %v371_v1 = vpop.xlane.xlu0 %370  ;;  %488 = vadd.xlane.f32.xlu1 %v487_v0  ;;  %479 = vadd.xlane.f32.xlu0 %v478_v57  ;;  %v374_v2 = vpop.xlane.xlu1 %373 }
  0xb2   : > { %v402_v4 = vmul.f32 0.03125, %v371_v1  ;;  %v403_v5 = vmul.f32 0.03125, %v374_v2  ;;  %v436_v7 = vmul.f32 %v1889_v62, %v1889_v62  ;;  %v437_v8 = vmul.f32 %v1893_v63, %v1893_v63 }
  0xb4   : > { %v1903_v6 = vsub.f32 %v1279_v16, %v402_v4  ;;  %v1907_v9 = vsub.f32 %v1280_v17, %v403_v5  ;;  %v472_v10 = vsel %vm344_vm0, %v436_v7, 0.0  ;;  %v475_v14 = vsel %vm344_vm0, %v437_v8, 0.0 }
  0xb5   : > { %v365_v11 = vpop.xlane.xlu0 %364  ;;  %482 = vadd.xlane.f32.xlu1 %v481_v3  ;;  %473 = vadd.xlane.f32.xlu0 %v472_v10  ;;  %v368_v12 = vpop.xlane.xlu1 %367 }
  0xb6   : > { %v400_v15 = vmul.f32 0.03125, %v365_v11  ;;  %v401_v19 = vmul.f32 0.03125, %v368_v12  ;;  %v434_v20 = vmul.f32 %v1903_v6, %v1903_v6  ;;  %v435_v16 = vmul.f32 %v1907_v9, %v1907_v9 }
  0xb8   : > { %v1917_v13 = vsub.f32 %v1275_v21, %v400_v15  ;;  %v1921_v17 = vsub.f32 %v1276_v22, %v401_v19  ;;  %v466_v24 = vsel %vm344_vm0, %v434_v20, 0.0  ;;  %v469_v30 = vsel %vm344_vm0, %v435_v16, 0.0 }
  0xb9   : > { %v359_v25 = vpop.xlane.xlu0 %358  ;;  %476 = vadd.xlane.f32.xlu1 %v475_v14  ;;  %467 = vadd.xlane.f32.xlu0 %v466_v24  ;;  %v362_v29 = vpop.xlane.xlu1 %361 }
  0xba   : > { %v398_v34 = vmul.f32 0.03125, %v359_v25  ;;  %v399_v35 = vmul.f32 0.03125, %v362_v29  ;;  %v432_v38 = vmul.f32 %v1917_v13, %v1917_v13  ;;  %v433_v21 = vmul.f32 %v1921_v17, %v1921_v17 }
  0xbc   : > { %v1931_v18 = vsub.f32 %v1271_v26, %v398_v34  ;;  %v1935_v22 = vsub.f32 %v1272_v27, %v399_v35  ;;  %v460_v39 = vsel %vm344_vm0, %v432_v38, 0.0  ;;  %v463_v42 = vsel %vm344_vm0, %v433_v21, 0.0 }
  0xbd   : > { %v353_v40 = vpop.xlane.xlu0 %352  ;;  %470 = vadd.xlane.f32.xlu1 %v469_v30  ;;  %461 = vadd.xlane.f32.xlu0 %v460_v39  ;;  %v356_v41 = vpop.xlane.xlu1 %355 }
  0xbe   : > { %v396_v43 = vmul.f32 0.03125, %v353_v40  ;;  %v397_v46 = vmul.f32 0.03125, %v356_v41  ;;  %v430_v47 = vmul.f32 %v1931_v18, %v1931_v18  ;;  %v431_v26 = vmul.f32 %v1935_v22, %v1935_v22 }
  0xc0   : > { %v1945_v23 = vsub.f32 %v1267_v31, %v396_v43  ;;  %v1949_v27 = vsub.f32 %v1268_v32, %v397_v46  ;;  %v454_v48 = vsel %vm344_vm0, %v430_v47, 0.0  ;;  %v457_v50 = vsel %vm344_vm0, %v431_v26, 0.0 }
  0xc1   : > { %464 = vadd.xlane.f32.xlu1 %v463_v42  ;;  %455 = vadd.xlane.f32.xlu0 %v454_v48  ;;  %v347_v49 = vpop.xlane.xlu0 %346  ;;  %v350_v51 = vpop.xlane.xlu1 %349  ;;  %v1985_v42 = vld [vmem:[%s2271_s3] ss:$0 sm:$0xff] }
  0xc2   : > { %v394_v54 = vmul.f32 0.03125, %v347_v49  ;;  %v395_v55 = vmul.f32 0.03125, %v350_v51  ;;  %v428_v56 = vmul.f32 %v1945_v23, %v1945_v23  ;;  %v429_v31 = vmul.f32 %v1949_v27, %v1949_v27 }
  0xc4   : > { %v1959_v28 = vsub.f32 %v1263_v36, %v394_v54  ;;  %v1963_v32 = vsub.f32 %v1264_v37, %v395_v55  ;;  %v448_v57 = vsel %vm344_vm0, %v428_v56, 0.0  ;;  %v451_v58 = vsel %vm344_vm0, %v429_v31, 0.0  ;;  %v1471_v36 = vld [vmem:[%s2270_s2] sm:$0xff]   ;;  %v1472_v37 = vld [vmem:[%s2270_s2 + $0x30] sm:$0xff]  }
  0xc5   : > { %458 = vadd.xlane.f32.xlu1 %v457_v50  ;;  %449 = vadd.xlane.f32.xlu0 %v448_v57 }
  0xc6   : > { %v426_v59 = vmul.f32 %v1959_v28, %v1959_v28  ;;  %v427_v60 = vmul.f32 %v1963_v32, %v1963_v32  ;;  %1367 = vmatprep.mubr.msk.bf16.mxu0 %vm344_vm0, %v1471_v36  ;;  %1379 = vmatprep.mubr.msk.bf16.mxu1 %vm344_vm0, %v1472_v37 }
  0xc8   : > { %v442_v61 = vsel %vm344_vm0, %v426_v59, 0.0  ;;  %v445_v33 = vsel %vm344_vm0, %v427_v60, 0.0 }
  0xc9   : > { %452 = vadd.xlane.f32.xlu1 %v451_v58  ;;  %443 = vadd.xlane.f32.xlu0 %v442_v61 }
  0xcd   : > { %446 = vadd.xlane.f32.xlu1 %v445_v33 }
 0x136   : > { %v486_v0 = vpop.xlane.xlu0 %485 }
 0x137   : > { %v504_v1 = vmul.f32 0.03125, %v486_v0 }
 0x139   : > { %v520_v2 = vadd.f32 1e-05, %v504_v1 }
 0x13a   : > { %v489_v3 = vpop.xlane.xlu1 %488  ;;  %v480_v4 = vpop.xlane.xlu0 %479 }
 0x13b   : > { %1481 = vrsqrt.f32 %v520_v2  ;;  %v505_v5 = vmul.f32 0.03125, %v489_v3  ;;  %v502_v7 = vmul.f32 0.03125, %v480_v4 }
 0x13d   : > { %v521_v8 = vadd.f32 1e-05, %v505_v5  ;;  %v518_v10 = vadd.f32 1e-05, %v502_v7 }
 0x13e   : > { %v483_v11 = vpop.xlane.xlu1 %482  ;;  %v474_v12 = vpop.xlane.xlu0 %473 }
 0x13f   : > { %1483 = vrsqrt.f32 %v521_v8  ;;  %v503_v14 = vmul.f32 0.03125, %v483_v11  ;;  %v500_v15 = vmul.f32 0.03125, %v474_v12 }
 0x140   : > { %1485 = vrsqrt.f32 %v518_v10 }
 0x141   : > { %v519_v19 = vadd.f32 1e-05, %v503_v14  ;;  %v516_v20 = vadd.f32 1e-05, %v500_v15 }
 0x142   : > { %v477_v16 = vpop.xlane.xlu1 %476  ;;  %v468_v24 = vpop.xlane.xlu0 %467 }
 0x143   : > { %1487 = vrsqrt.f32 %v519_v19  ;;  %v501_v25 = vmul.f32 0.03125, %v477_v16  ;;  %v498_v29 = vmul.f32 0.03125, %v468_v24 }
 0x144   : > { %1489 = vrsqrt.f32 %v516_v20 }
 0x145   : > { %v517_v30 = vadd.f32 1e-05, %v501_v25  ;;  %v514_v34 = vadd.f32 1e-05, %v498_v29 }
 0x146   : > { %v471_v35 = vpop.xlane.xlu1 %470  ;;  %v462_v39 = vpop.xlane.xlu0 %461 }
 0x147   : > { %1491 = vrsqrt.f32 %v517_v30  ;;  %v499_v38 = vmul.f32 0.03125, %v471_v35  ;;  %v496_v46 = vmul.f32 0.03125, %v462_v39 }
 0x148   : > { %v1482_v21 = vpop.eup %1481  ;;  %1493 = vrsqrt.f32 %v514_v34 }
 0x149   : > { %v515_v40 = vadd.f32 1e-05, %v499_v38  ;;  %v552_v41 = vmul.f32 %v1482_v21, %v1865_v44  ;;  %v1992_v44 = vld [vmem:[%s2272_s4] ss:$0 sm:$0xff]  ;;  %v512_v56 = vadd.f32 1e-05, %v496_v46 }
 0x14a   : > { %v465_v43 = vpop.xlane.xlu1 %464  ;;  %v456_v58 = vpop.xlane.xlu0 %455 }
 0x14b   : > { %1495 = vrsqrt.f32 %v515_v40  ;;  %v497_v47 = vmul.f32 0.03125, %v465_v43  ;;  %v575_v48 = vmul.f32 %v1985_v42, %v552_v41  ;;  %v494_v37 = vmul.f32 0.03125, %v456_v58 }
 0x14c   : > { %v1484_v26 = vpop.eup %1483 }
 0x14d   : > { %v1486_v49 = vpop.eup %1485  ;;  %v513_v50 = vadd.f32 1e-05, %v497_v47  ;;  %v553_v51 = vmul.f32 %v1484_v26, %v1875_v52  ;;  %v598_v59 = vadd.f32 %v1992_v44, %v575_v48  ;;  %v510_v10 = vadd.f32 1e-05, %v494_v37 }
 0x14e   : > { %v459_v54 = vpop.xlane.xlu1 %458  ;;  %v550_v55 = vmul.f32 %v1486_v49, %v1867_v45  ;;  %v450_v15 = vpop.xlane.xlu0 %449 }
 0x14f   : > { %v576_v31 = vmul.f32 %v1985_v42, %v553_v51  ;;  %1497 = vrsqrt.f32 %v513_v50  ;;  %v495_v61 = vmul.f32 0.03125, %v459_v54  ;;  %v492_v24 = vmul.f32 0.03125, %v450_v15 }
 0x150   : > { %v1488_v57 = vpop.eup %1487  ;;  %v573_v36 = vmul.f32 %v1985_v42, %v550_v55  ;;  %1499 = vrsqrt.f32 %v512_v56 }
 0x151   : > { %v1490_v60 = vpop.eup %1489  ;;  %v599_v52 = vadd.f32 %v1992_v44, %v576_v31  ;;  %v551_v33 = vmul.f32 %v1488_v57, %v1879_v53  ;;  %v511_v3 = vadd.f32 1e-05, %v495_v61 }
 0x152   : > { %v548_v45 = vmul.f32 %v1490_v60, %v1889_v62  ;;  %v453_v53 = vpop.xlane.xlu1 %452  ;;  %v596_v7 = vadd.f32 %v1992_v44, %v573_v36  ;;  %v444_v43 = vpop.xlane.xlu0 %443 }
 0x153   : > { %v607_v0 = vpack.c.bf16 %v599_v52, %v598_v59  ;;  %v574_v2 = vmul.f32 %v1985_v42, %v551_v33  ;;  %1501 = vrsqrt.f32 %v511_v3  ;;  %v493_v20 = vmul.f32 0.03125, %v453_v53 }
 0x154   : > { %v1492_v1 = vpop.eup %1491  ;;  %v571_v11 = vmul.f32 %v1985_v42, %v548_v45  ;;  %1503 = vrsqrt.f32 %v510_v10  ;;  %v490_v26 = vmul.f32 0.03125, %v444_v43 }
 0x155   : > { %1403 = vmatprep.subr.msk.bf16.mxu0 %vm344_vm0, %v607_v0  ;;  %1404 = vmatprep.subr.msk.bf16.mxu1 %vm344_vm0, %v607_v0  ;;  %v730_v4 = vsel %vm344_vm0, %v607_v0, 0  ;;  %v549_v5 = vmul.f32 %v1492_v1, %v1893_v63  ;;  %v597_v8 = vadd.f32 %v1992_v44, %v574_v2  ;;  %v1494_v62 = vpop.eup %1493  ;;  %v509_v30 = vadd.f32 1e-05, %v493_v20 }
 0x156   : > { %1352 = vmatpush3.bf16.xpose.msra.mxu0 %v730_v4  ;;  %1395 = vmatpush3.bf16.xpose.msra.mxu1 %v730_v4  ;;  %v594_v25 = vadd.f32 %v1992_v44, %v571_v11  ;;  %v546_v29 = vmul.f32 %v1494_v62, %v1903_v6  ;;  %v447_v39 = vpop.xlane.xlu1 %446  ;;  %v506_v31 = vadd.f32 1e-05, %v490_v26 }
 0x157   : > { %v572_v12 = vmul.f32 %v1985_v42, %v549_v5  ;;  %v606_v19 = vpack.c.bf16 %v597_v8, %v596_v7  ;;  %1505 = vrsqrt.f32 %v509_v30  ;;  %v491_v6 = vmul.f32 0.03125, %v447_v39  ;;  %v1480_v30 = vld [vmem:[%s2270_s2 + $0x28] sm:$0xff]  }
 0x158   : > { %v1496_v14 = vpop.eup %1495  ;;  %v569_v40 = vmul.f32 %v1985_v42, %v546_v29  ;;  %v1479_v29 = vld [vmem:[%s2270_s2 + $0x20] sm:$0xff]  }
 0x159   : > { %v595_v63 = vadd.f32 %v1992_v44, %v572_v12  ;;  %v547_v16 = vmul.f32 %v1496_v14, %v1907_v9  ;;  %1405 = vmatprep.subr.msk.bf16.mxu0 %vm344_vm0, %v606_v19  ;;  %1406 = vmatprep.subr.msk.bf16.mxu1 %vm344_vm0, %v606_v19  ;;  %v727_v34 = vsel %vm344_vm0, %v606_v19, 0  ;;  %v508_v9 = vadd.f32 1e-05, %v492_v24  ;;  %v1476_v24 = vld [vmem:[%s2270_s2 + $0x18] sm:$0xff]  }
 0x15a   : > { %v592_v48 = vadd.f32 %v1992_v44, %v569_v40  ;;  %v507_v50 = vadd.f32 1e-05, %v491_v6 }
 0x15b   : > { %v605_v35 = vpack.c.bf16 %v595_v63, %v594_v25  ;;  %v570_v38 = vmul.f32 %v1985_v42, %v547_v16  ;;  %1507 = vrsqrt.f32 %v508_v9  ;;  %v1475_v63 = vld [vmem:[%s2270_s2 + $0x10] sm:$0xff]   ;;  %v1477_v16 = vld [vmem:[%s2270_s2 + $0x40] sm:$0xff]   ;;  %v1478_v25 = vld [vmem:[%s2270_s2 + $0x48] sm:$0xff]  }
 0x15c   : > { %v1498_v21 = vpop.eup %1497  ;;  %1509 = vrsqrt.f32 %v507_v50 }
 0x15d   : > { %v1500_v41 = vpop.eup %1499  ;;  %v593_v46 = vadd.f32 %v1992_v44, %v570_v38  ;;  %v545_v47 = vmul.f32 %v1498_v21, %v1921_v17  ;;  %v724_v51 = vsel %vm344_vm0, %v605_v35, 0  ;;  %1511 = vrsqrt.f32 %v506_v31 }
 0x15e   : > { %1354 = vmatpush3.bf16.xpose.msra.mxu0 %v727_v34  ;;  %1396 = vmatpush3.bf16.xpose.msra.mxu1 %v727_v34  ;;  %v544_v49 = vmul.f32 %v1500_v41, %v1917_v13 }
 0x15f   : > { %1407 = vmatprep.subr.msk.bf16.mxu0 %vm344_vm0, %v605_v35  ;;  %1408 = vmatprep.subr.msk.bf16.mxu1 %vm344_vm0, %v605_v35  ;;  %v604_v54 = vpack.c.bf16 %v593_v46, %v592_v48  ;;  %v568_v55 = vmul.f32 %v1985_v42, %v545_v47 }
 0x160   : > { %v1502_v56 = vpop.eup %1501  ;;  %v567_v17 = vmul.f32 %v1985_v42, %v544_v49 }
 0x161   : > { %v1504_v57 = vpop.eup %1503  ;;  %v591_v13 = vadd.f32 %v1992_v44, %v568_v55  ;;  %v543_v58 = vmul.f32 %v1502_v56, %v1935_v22  ;;  %v721_v61 = vsel %vm344_vm0, %v604_v54, 0 }
 0x162   : > { %v590_v59 = vadd.f32 %v1992_v44, %v567_v17  ;;  %v542_v60 = vmul.f32 %v1504_v57, %v1931_v18 }
 0x163   : > { %v566_v33 = vmul.f32 %v1985_v42, %v543_v58 }
 0x164   : > { %v603_v52 = vpack.c.bf16 %v591_v13, %v590_v59  ;;  %v1506_v36 = vpop.eup %1505  ;;  %v565_v37 = vmul.f32 %v1985_v42, %v542_v60 }
 0x165   : > { %v589_v0 = vadd.f32 %v1992_v44, %v566_v33  ;;  %v541_v45 = vmul.f32 %v1506_v36, %v1949_v27 }
 0x166   : > { %1356 = vmatpush3.bf16.xpose.msra.mxu0 %v724_v51  ;;  %1397 = vmatpush3.bf16.xpose.msra.mxu1 %v724_v51  ;;  %v588_v18 = vadd.f32 %v1992_v44, %v565_v37  ;;  %v718_v2 = vsel %vm344_vm0, %v603_v52, 0 }
 0x167   : > { %1409 = vmatprep.subr.msk.bf16.mxu0 %vm344_vm0, %v604_v54  ;;  %1410 = vmatprep.subr.msk.bf16.mxu1 %vm344_vm0, %v604_v54  ;;  %v564_v4 = vmul.f32 %v1985_v42, %v541_v45 }
 0x168   : > { %v1508_v22 = vpop.eup %1507  ;;  %v602_v3 = vpack.c.bf16 %v589_v0, %v588_v18 }
 0x169   : > { %v540_v1 = vmul.f32 %v1508_v22, %v1945_v23  ;;  %v1510_v5 = vpop.eup %1509  ;;  %v587_v27 = vadd.f32 %v1992_v44, %v564_v4 }
 0x16a   : > { %v1512_v7 = vpop.eup %1511  ;;  %v539_v8 = vmul.f32 %v1510_v5, %v1963_v32  ;;  %v715_v10 = vsel %vm344_vm0, %v602_v3, 0 }
 0x16b   : > { %v563_v53 = vmul.f32 %v1985_v42, %v540_v1  ;;  %v538_v62 = vmul.f32 %v1512_v7, %v1959_v28 }
 0x16c   : > { %v562_v12 = vmul.f32 %v1985_v42, %v539_v8 }
 0x16d   : > { %v586_v23 = vadd.f32 %v1992_v44, %v563_v53  ;;  %v561_v14 = vmul.f32 %v1985_v42, %v538_v62  ;;  %v1473_v42 = vld [vmem:[%s2270_s2 + $0x8] sm:$0xff]  }
 0x16e   : > { %1358 = vmatpush3.bf16.xpose.msra.mxu0 %v721_v61  ;;  %1398 = vmatpush3.bf16.xpose.msra.mxu1 %v721_v61  ;;  %v585_v15 = vadd.f32 %v1992_v44, %v562_v12 }
 0x16f   : > { %1411 = vmatprep.subr.msk.bf16.mxu0 %vm344_vm0, %v603_v52  ;;  %1412 = vmatprep.subr.msk.bf16.mxu1 %vm344_vm0, %v603_v52  ;;  %v601_v11 = vpack.c.bf16 %v587_v27, %v586_v23  ;;  %v584_v32 = vadd.f32 %v1992_v44, %v561_v14  ;;  %v1474_v44 = vld [vmem:[%s2270_s2 + $0x38] sm:$0xff]  }
 0x171   : > { %v712_v19 = vsel %vm344_vm0, %v601_v11, 0  ;;  %v600_v28 = vpack.c.bf16 %v585_v15, %v584_v32  ;;  %v2119_v15 = vld [vmem:[%s310_s20] ss:$0 sm:$0xff]  ;;  %s1679_s20 = smov [#allocation4]  }
 0x172   : > { %s1565_s13 = sshll.u32 %s1679_s20, 4  ;;  %s1566_s13 = int_to_ptr.vmem [resolvable:$false] %s1565_s13 }
 0x173   : > { %v709_v20 = vsel %vm344_vm0, %v600_v28, 0  ;;  %s1567_s14 = scalar_lea.vmem %s1566_s13, 512  ;;  %p1568_p1 = scmp.lt.s32.totalorder %s2133_s23, %s1566_s13 }
 0x174   : > { %p1569_p2 = scmp.lt.s32.totalorder %s1567_s14, %s1561_s19 }
 0x176   : > { %1360 = vmatpush3.bf16.xpose.msra.mxu0 %v718_v2  ;;  %1399 = vmatpush3.bf16.xpose.msra.mxu1 %v718_v2  ;;  %p1570_p3 = por %p1569_p2, %p1568_p1 }
 0x177   : > { %1413 = vmatprep.subr.msk.bf16.mxu0 %vm344_vm0, %v602_v3  ;;  %1414 = vmatprep.subr.msk.bf16.mxu1 %vm344_vm0, %v602_v3 }
 0x178   : > { %p1571_p4 = pnand %p1570_p3, %p1564_p0 }
 0x17e   : > { %1362 = vmatpush3.bf16.xpose.msra.mxu0 %v715_v10  ;;  %1400 = vmatpush3.bf16.xpose.msra.mxu1 %v715_v10 }
 0x17f   : > { %1415 = vmatprep.subr.msk.bf16.mxu0 %vm344_vm0, %v601_v11  ;;  %1416 = vmatprep.subr.msk.bf16.mxu1 %vm344_vm0, %v601_v11 }
 0x186   : > { %1364 = vmatpush3.bf16.xpose.msra.mxu0 %v712_v19  ;;  %1401 = vmatpush3.bf16.xpose.msra.mxu1 %v712_v19 }
 0x187   : > { %1417 = vmatprep.subr.msk.bf16.mxu0 %vm344_vm0, %v600_v28  ;;  %1418 = vmatprep.subr.msk.bf16.mxu1 %vm344_vm0, %v600_v28 }
 0x18e   : > { %1366 = vmatpush3.bf16.xpose.msra.mxu0 %v709_v20  ;;  %1402 = vmatpush3.bf16.xpose.msra.mxu1 %v709_v20 }
 0x195   : > { %1368 = vmatmul.mubr.msk.bf16.vlgmr.msra.gmra.mxu0 %vm344_vm0, %v1473_v42  ;;  %1380 = vmatmul.mubr.msk.bf16.vlgmr.msra.gmra.mxu1 %vm344_vm0, %v1474_v44 }
 0x196   : > { %1371 = vmatprep.mubr.msk.bf16.mxu0 %vm344_vm0, %v1475_v63  ;;  %1383 = vmatprep.mubr.msk.bf16.mxu1 %vm344_vm0, %v1477_v16 }
 0x19d   : > { %1372 = vmatmul.mubr.msk.bf16.gmra.mxu0 %vm344_vm0, %v1476_v24  ;;  %1384 = vmatmul.mubr.msk.bf16.gmra.mxu1 %vm344_vm0, %v1478_v25 }
 0x19e   : > { %1375 = vmatprep.mubr.msk.bf16.mxu0 %vm344_vm0, %v1479_v29 }
 0x1a5   : > { %1376 = vmatmul.mubr.msk.bf16.gmra.mxu0 %vm344_vm0, %v1480_v30 }
 0x255   : > { %v2095_v34 = vpop.f32.mrf.mxu0  ;;  %v1381_v35 = vpop.f32.mrf.mxu1 }
 0x256   : > { %v1227_v38 = vmul.f32 -1.442695, %v1381_v35 }
 0x257   : > { %v2097_v21 = vpop.f32.mrf.mxu0  ;;  %v814_v39 = vpop.f32.mrf.mxu1 }
 0x258   : > { %1513 = vpow2.f32 %v1227_v38  ;;  %v1225_v9 = vmul.f32 -1.442695, %v814_v39 }
 0x259   : > { %v2099_v40 = vpop.f32.mrf.mxu0  ;;  %v1382_v41 = vpop.f32.mrf.mxu1 }
 0x25a   : > { %1515 = vpow2.f32 %v1225_v9  ;;  %v1228_v43 = vmul.f32 -1.442695, %v1382_v41 }
 0x25b   : > { %v2101_v6 = vpop.f32.mrf.mxu0  ;;  %v817_v46 = vpop.f32.mrf.mxu1 }
 0x25c   : > { %1517 = vpow2.f32 %v1228_v43  ;;  %v1226_v47 = vmul.f32 -1.442695, %v817_v46 }
 0x25d   : > { %v2103_v26 = vpop.f32.mrf.mxu0  ;;  %v1385_v48 = vpop.f32.mrf.mxu1 }
 0x25e   : > { %1519 = vpow2.f32 %v1226_v47  ;;  %v1235_v49 = vmul.f32 -1.442695, %v1385_v48  ;;  %v906_v28 = vmul.f32 %v2103_v26, %v2119_v15 }
 0x25f   : > { %v2105_v50 = vpop.f32.mrf.mxu0  ;;  %v830_v51 = vpop.f32.mrf.mxu1 }
 0x260   : > { %1521 = vpow2.f32 %v1235_v49  ;;  %v1233_v54 = vmul.f32 -1.442695, %v830_v51  ;;  %v904_v24 = vmul.f32 %v2119_v15, %v2105_v50 }
 0x261   : > { %v1374_v55 = vpop.f32.mrf.mxu0  ;;  %v1386_v56 = vpop.f32.mrf.mxu1 }
 0x262   : > { %1523 = vpow2.f32 %v1233_v54  ;;  %v1236_v31 = vmul.f32 -1.442695, %v1386_v56  ;;  %v907_v20 = vmul.f32 %v1374_v55, %v2119_v15 }
 0x263   : > { %v2107_v17 = vpop.f32.mrf.mxu0  ;;  %v833_v57 = vpop.f32.mrf.mxu1 }
 0x264   : > { %1525 = vpow2.f32 %v1236_v31  ;;  %v1234_v13 = vmul.f32 -1.442695, %v833_v57  ;;  %v905_v29 = vmul.f32 %v2119_v15, %v2107_v17 }
 0x265   : > { %v1514_v58 = vpop.eup %1513  ;;  %v1377_v59 = vpop.f32.mrf.mxu0 }
 0x266   : > { %v922_v60 = vadd.f32 1.0, %v1514_v58  ;;  %v1219_v61 = vmul.f32 -1.442695, %v1377_v59  ;;  %1527 = vpow2.f32 %v1234_v13 }
 0x267   : > { %v1516_v52 = vpop.eup %1515  ;;  %v798_v33 = vpop.f32.mrf.mxu0 }
 0x268   : > { %1529 = vrcp.f32 %v922_v60  ;;  %v920_v36 = vadd.f32 1.0, %v1516_v52  ;;  %v1217_v37 = vmul.f32 -1.442695, %v798_v33 }
 0x269   : > { %v1518_v22 = vpop.eup %1517  ;;  %1531 = vpow2.f32 %v1219_v61  ;;  %v1378_v0 = vpop.f32.mrf.mxu0 }
 0x26a   : > { %1533 = vrcp.f32 %v920_v36  ;;  %v923_v45 = vadd.f32 1.0, %v1518_v22  ;;  %v1220_v18 = vmul.f32 -1.442695, %v1378_v0 }
 0x26b   : > { %v1520_v1 = vpop.eup %1519  ;;  %1535 = vpow2.f32 %v1217_v37  ;;  %v801_v2 = vpop.f32.mrf.mxu0 }
 0x26c   : > { %1537 = vrcp.f32 %v923_v45  ;;  %v921_v3 = vadd.f32 1.0, %v1520_v1  ;;  %v1218_v4 = vmul.f32 -1.442695, %v801_v2 }
 0x26d   : > { %v1522_v5 = vpop.eup %1521  ;;  %1539 = vpow2.f32 %v1220_v18 }
 0x26e   : > { %1541 = vrcp.f32 %v921_v3  ;;  %v970_v53 = vadd.f32 1.0, %v1522_v5 }
 0x26f   : > { %v1524_v7 = vpop.eup %1523  ;;  %1543 = vpow2.f32 %v1218_v4 }
 0x270   : > { %v968_v27 = vadd.f32 1.0, %v1524_v7  ;;  %1545 = vrcp.f32 %v970_v53 }
 0x271   : > { %v1526_v8 = vpop.eup %1525 }
 0x272   : > { %v971_v23 = vadd.f32 1.0, %v1526_v8  ;;  %1547 = vrcp.f32 %v968_v27 }
 0x273   : > { %v1528_v62 = vpop.eup %1527 }
 0x274   : > { %1549 = vrcp.f32 %v971_v23  ;;  %v969_v10 = vadd.f32 1.0, %v1528_v62 }
 0x275   : > { %v1530_v11 = vpop.eup %1529 }
 0x276   : > { %v1532_v12 = vpop.eup %1531  ;;  %1551 = vrcp.f32 %v969_v10  ;;  %v934_v16 = vmul.f32 %v1530_v11, %v906_v28 }
 0x277   : > { %v1534_v14 = vpop.eup %1533  ;;  %v870_v32 = vadd.f32 1.0, %v1532_v12 }
 0x278   : > { %v1536_v19 = vpop.eup %1535  ;;  %v932_v39 = vmul.f32 %v1534_v14, %v904_v24 }
 0x279   : > { %v1538_v42 = vpop.eup %1537  ;;  %v868_v44 = vadd.f32 1.0, %v1536_v19  ;;  %1553 = vrcp.f32 %v870_v32 }
 0x27a   : > { %v1540_v63 = vpop.eup %1539  ;;  %v935_v25 = vmul.f32 %v1538_v42, %v907_v20 }
 0x27b   : > { %v1542_v30 = vpop.eup %1541  ;;  %v871_v35 = vadd.f32 1.0, %v1540_v63  ;;  %1555 = vrcp.f32 %v868_v44 }
 0x27c   : > { %v1544_v38 = vpop.eup %1543  ;;  %v1311_v9 = vpack.c.bf16 %v935_v25, %v934_v16  ;;  %v933_v41 = vmul.f32 %v1542_v30, %v905_v29 }
 0x27d   : > { %1557 = vrcp.f32 %v871_v35  ;;  %v869_v43 = vadd.f32 1.0, %v1544_v38  ;;  %v1546_v47 = vpop.eup %1545 }
 0x27e   : > { %1331 = vst [vmem:[%s294_s22 + $0x8] sm:$0xff] %v1311_v9   ;;  %v1306_v46 = vpack.c.bf16 %v933_v41, %v932_v39 }
 0x27f   : > { %1559 = vrcp.f32 %v869_v43  ;;  %v1548_v26 = vpop.eup %1547 }
 0x280   : > { %1307 = vst [vmem:[%s294_s22] sm:$0xff] %v1306_v46  }
 0x281   : > { %v1550_v48 = vpop.eup %1549 }
 0x282   : > { %1574 = shalt.err (!%p1571_p4)
}
 0x283   : > { %s1575_s22 = scalar_lea.hbm %s2139_s28, 256  ;;  %s1579_s20 = scalar_lea.hbm %s2274_s6, 512 }
 0x284   : > { %p1576_p7 = scmp.ne.s32.totalorder %s2139_s28, %s1575_s22  ;;  %p1580_p10 = scmp.lt.s32.totalorder %s2139_s28, %s2274_s6 }
 0x285   : > { %p1581_p11 = scmp.lt.s32.totalorder %s1579_s20, %s1575_s22 }
 0x286   : > { %p1577_p8 = pnand %p1576_p7, %p1765_p5 }
 0x287   : > { %p1582_p12 = por %p1581_p11, %p1580_p10 }
 0x288   : > { %p1578_p9 = pneg %p1577_p8 }
 0x28a   : > { %p1583_p13 = pnand %p1582_p12, %p1578_p9 }
 0x28c   : > { %1586 = shalt.err (!%p1583_p13)
}
 0x28d   : > { %s2278_s19 = smov 64   ;;  %s2280_s29 = smov 128   ;;  %v1321_v49 = vpack.c.bf16 %v1550_v48, %v1546_v47  ;;  %v1552_v50 = vpop.eup %1551 }
 0x28e   : > { %s1682_s13 = smov 4   ;;  %s2284_s17 = sshll.u32 %s2142_s15, 4  ;;  %v1316_v51 = vpack.c.bf16 %v1552_v50, %v1548_v26  ;;  %s2173_s17 = int_to_ptr.vmem [resolvable:$true] %s2284_s17 }
 0x28f   : > { %1420 = dma.vmem_to_hbm [thread:$0]  (%p1765_p5), %s2133_s23, 256, %s2139_s28, %s2145_s18, %s2278_s19, %s2280_s29, %s1682_s13  }
 0x290   : > { %1332 = vst [vmem:[%s2142_s15 + $0x8] sm:$0xff] %v1321_v49   ;;  %s2180_s22 = scalar_lea.hbm %s2275_s7, %s2131_s9  ;;  %1317 = vst [vmem:[%s2142_s15] sm:$0xff] %v1316_v51   ;;  %s1587_s8 = scalar_lea.vmem %s2173_s17, 256 }
 0x291   : > { %p1588_p0 = scmp.ne.s32.totalorder %s2173_s17, %s1587_s8  ;;  %s1683_s23 = smov [#allocation6]  }
 0x292   : > { %s1591_s28 = sshll.u32 %s1683_s23, 4  ;;  %s1592_s28 = int_to_ptr.vmem [resolvable:$false] %s1591_s28 }
 0x293   : > { %p1589_p1 = pnand %p1588_p0, %p1765_p5  ;;  %s1593_s20 = scalar_lea.vmem %s1592_s28, 512 }
 0x294   : > { %p1594_p3 = scmp.lt.s32.totalorder %s2173_s17, %s1592_s28  ;;  %p1595_p4 = scmp.lt.s32.totalorder %s1593_s20, %s1587_s8 }
 0x295   : > { %p1590_p2 = pneg %p1589_p1 }
 0x296   : > { %p1596_p7 = por %p1595_p4, %p1594_p3 }
 0x298   : > { %p1597_p8 = pnand %p1596_p7, %p1590_p2 }
 0x29a   : > { %1600 = shalt.err (!%p1597_p8)
}
 0x29b   : > { %s1601_s16 = scalar_lea.hbm %s2180_s22, 256  ;;  %s1605_s23 = scalar_lea.hbm %s2275_s7, 512 }
 0x29c   : > { %p1602_p9 = scmp.ne.s32.totalorder %s2180_s22, %s1601_s16  ;;  %p1606_p12 = scmp.lt.s32.totalorder %s2180_s22, %s2275_s7 }
 0x29d   : > { %p1607_p13 = scmp.lt.s32.totalorder %s1605_s23, %s1601_s16 }
 0x29e   : > { %p1603_p10 = pnand %p1602_p9, %p1765_p5 }
 0x29f   : > { %p1608_p0 = por %p1607_p13, %p1606_p12 }
 0x2a0   : > { %p1604_p11 = pneg %p1603_p10 }
 0x2a2   : > { %p1609_p1 = pnand %p1608_p0, %p1604_p11 }
 0x2a4   : > { %1612 = shalt.err (!%p1609_p1)
}
 0x2a5   : > { %s2285_s8 = smov 128   ;;  %s2286_s28 = smov 64   ;;  %v1554_v54 = vpop.eup %1553  ;;  %v854_v56 = vmul.f32 %v2095_v34, %v2119_v15  ;;  %v855_v31 = vmul.f32 %v2099_v40, %v2119_v15  ;;  %v852_v57 = vmul.f32 %v2119_v15, %v2097_v21  ;;  %v853_v13 = vmul.f32 %v2119_v15, %v2101_v6 }
 0x2a6   : > { %1421 = dma.vmem_to_hbm [thread:$0]  (%p1765_p5), %s2173_s17, 256, %s2180_s22, %s2145_s18, %s2286_s28, %s2285_s8, %s1682_s13   ;;  %v1556_v55 = vpop.eup %1555 }
 0x2a7   : > { %v1558_v17 = vpop.eup %1557  ;;  %v882_v58 = vmul.f32 %v1554_v54, %v854_v56  ;;  %s287_s18 = scalar_lea.vmem [#allocation2], %s2117_s21  ;;  %v880_v61 = vmul.f32 %v1556_v55, %v852_v57  ;;  %s2220_s22 = scalar_lea.hbm %s2273_s5, %s2131_s9 }
 0x2a8   : > { %v883_v59 = vmul.f32 %v1558_v17, %v855_v31  ;;  %v1560_v60 = vpop.eup %1559  ;;  %s1023_s19 = sshll.u32 %s287_s18, 4  ;;  %s2287_s20 = sand.u32 1, %s1669_s25   ;;  %s2222_s19 = int_to_ptr.vmem [resolvable:$true] %s1023_s19 }
 0x2a9   : > { %v881_v52 = vmul.f32 %v1560_v60, %v853_v13  ;;  %s1001_s16 = scalar_lea.sflag [#allocation3], %s2287_s20  ;;  %s1613_s21 = scalar_lea.vmem %s2222_s19, 256 }
 0x2aa   : > { %v1301_v34 = vpack.c.bf16 %v883_v59, %v882_v58  ;;  %p1614_p2 = scmp.ne.s32.totalorder %s2222_s19, %s1613_s21  ;;  %s1684_s15 = smov [#allocation2]  }
 0x2ab   : > { %v1296_v33 = vpack.c.bf16 %v881_v52, %v880_v61  ;;  %s1617_s14 = sshll.u32 %s1684_s15, 4  ;;  %s1618_s14 = int_to_ptr.vmem [resolvable:$false] %s1617_s14 }
 0x2ac   : > { %1330 = vst [vmem:[%s287_s18 + $0x8] sm:$0xff] %v1301_v34   ;;  %p1615_p3 = pnand %p1614_p2, %p1765_p5  ;;  %s1619_s23 = scalar_lea.vmem %s1618_s14, 512 }
 0x2ad   : > { %1297 = vst [vmem:[%s287_s18] sm:$0xff] %v1296_v33   ;;  %p1620_p7 = scmp.lt.s32.totalorder %s2222_s19, %s1618_s14  ;;  %p1621_p8 = scmp.lt.s32.totalorder %s1619_s23, %s1613_s21 }
 0x2ae   : > { %p1616_p4 = pneg %p1615_p3 }
 0x2af   : > { %p1622_p9 = por %p1621_p8, %p1620_p7 }
 0x2b1   : > { %p1623_p10 = pnand %p1622_p9, %p1616_p4 }
 0x2b3   : > { %1626 = shalt.err (!%p1623_p10)
}
 0x2b4   : > { %s1627_s9 = scalar_lea.hbm %s2220_s22, 256  ;;  %s1631_s17 = scalar_lea.hbm %s2273_s5, 512 }
 0x2b5   : > { %p1628_p11 = scmp.ne.s32.totalorder %s2220_s22, %s1627_s9  ;;  %p1632_p0 = scmp.lt.s32.totalorder %s2220_s22, %s2273_s5 }
 0x2b6   : > { %p1633_p1 = scmp.lt.s32.totalorder %s1631_s17, %s1627_s9 }
 0x2b7   : > { %p1629_p12 = pnand %p1628_p11, %p1765_p5 }
 0x2b8   : > { %p1634_p2 = por %p1633_p1, %p1632_p0 }
 0x2b9   : > { %p1630_p13 = pneg %p1629_p12 }
 0x2bb   : > { %p1635_p3 = pnand %p1634_p2, %p1630_p13 }
 0x2bd   : > { %1638 = shalt.err (!%p1635_p3)
}
 0x2be   : > { %1419 = dma.vmem_to_hbm [thread:$0]  (%p1765_p5), %s2222_s19, 256, %s2220_s22, %s1001_s16, %s2286_s28, %s2285_s8, %s1682_s13  }
 0x2bf PF: > { %p1435_p4 = scmp.ge.s32.totalorder %s1677_s27, 2  ;;  %s1068_s21 = sand.u32 1, %s1665_s24  }
 0x2c0   : > { %s1069_s14 = scalar_lea.sflag [#allocation3], %s1068_s21 }
 0x2c1   : > { %p1426_p7 = pnand %p1435_p4, %p1769_p6 }
 0x2c3   : > { %p1427_p8 = pneg %p1426_p7 }
 0x2c5   : > { %1656 = dma.done.wait (%p1427_p8), %s1069_s14, 256  }
 0x2c6   : > { %1658 = vsyncadd (%p1427_p8), %s1069_s14, 4294967040  ;;  %s2288_s11 = sadd.s32 4294967294, %s1677_s27  }
 0x2c7   : > { %s1077_s23 = sand.u32 1, %s2288_s11  }
 0x2c8   : > { %s1078_s9 = scalar_lea.sflag [#allocation5], %s1077_s23 }
 0x2c9   : > { %1660 = dma.done.wait (%p1427_p8), %s1078_s9, 512  }
 0x2ca   : > { %1662 = vsyncadd (%p1427_p8), %s1078_s9, 4294966784  ;;  %p21_p5 = scmp.ge.s32.totalorder %s1750_s30, 4   ;;  %s2289_s24 = smov %s1669_s25 }
 0x2cb   : > { %s2290_s25 = smov %s1673_s26  ;;  %s2291_s26 = smov %s1763_s10 }
 0x2cc   : > { %s2292_s27 = smov %s1750_s30  ;;  %23 = sbr.rel (!%p21_p5) target bundleno = 5 (0x5), region = 110 }
 0x2d1   :  { %1092 = vsyncpa [#allocation3], 1 }
 0x2d2   :  { %1094 = vsyncpa [#allocation3 + $0x1], 1 }
 0x2d3   :  { %1095 = vsyncpa [#allocation5], 1 }
 0x2d4   :  { %1097 = vsyncpa [#allocation5 + $0x1], 1 }

</bundles_post_ra>
